<compile_context>
chip_gen: v7x
topology: tpu7x:2x2x1
jax: 0.10.0
libtpu: 0.0.40
codegen_flags: <defaults>
</compile_context>

<pallas_src>
import functools

import jax
import jax.numpy as jnp
from jax.experimental import pallas as pl
from jax.experimental.pallas import tpu as pltpu

EPSILON = 1e-12
_BLOCK_TARGET_BYTES = 4 << 20   # ~4 MiB per input block per pipeline buffer
_MAX_LANE_CHUNKS = 64           # cap on 128-lane chunks per block (unroll bound)
_ROW_TILE = 64                  # rows per block: 3 accumulators = 24 vregs
_FOLD_ROW_TARGET = 512          # fold pixel axis until ~this many rows
_FOLD_MIN_WIDTH = 256           # keep >= this many pixels per folded row


def _round_up(x, m):
    return ((x + m - 1) // m) * m


def _cdiv(a, b):
    return -(-a // b)


def _sublane_packing(dtype):
    # f32 -> 8, bf16 -> 16, int8/fp8 -> 32
    return max(1, 4 // jnp.dtype(dtype).itemsize) * 8


def _choose_fold(R, HW, row_target=_FOLD_ROW_TARGET, min_width=_FOLD_MIN_WIDTH):
    """Largest divisor of HW that fattens the row axis toward `row_target`
    while keeping folded rows at least `min_width` pixels wide (free reshape)."""
    if R >= row_target or HW < 2 * min_width:
        return 1
    max_fold = min(HW // min_width, row_target // R)
    for f in range(max_fold, 1, -1):
        if HW % f == 0:
            return f
    return 1


def _dice_sums_kernel(p_ref, t_ref, acc_ref, *, tc, n_col, w_valid, needs_col_mask):
    """Accumulate lane-dense per-row partials of sum(p*t), sum(p*p), sum(t*t).

    acc_ref holds three 128-lane stripes: [0:128]=p*t, [128:256]=p*p,
    [256:384]=t*t.  The 128->1 cross-lane reduce is left to the JAX epilogue.
    """
    j = pl.program_id(1)

    @pl.when(j == 0)
    def _():
        acc_ref[...] = jnp.zeros_like(acc_ref)

    tr = p_ref.shape[0]
    nk = tc // 128

    if needs_col_mask:
        lane = jax.lax.broadcasted_iota(jnp.int32, (tr, 128), 1)
        # Only the last column tile is ragged; chunks below `mask_from` are
        # fully valid in every tile and skip the select entirely.
        w_last = w_valid - (n_col - 1) * tc
        mask_from = w_last // 128
        col0 = j * tc
    else:
        mask_from = nk

    pt = jnp.zeros((tr, 128), jnp.float32)
    pp = jnp.zeros((tr, 128), jnp.float32)
    tt = jnp.zeros((tr, 128), jnp.float32)
    for k in range(nk):
        sl = slice(k * 128, (k + 1) * 128)
        x = p_ref[:, sl].astype(jnp.float32)
        t = t_ref[:, sl].astype(jnp.float32)
        # sigmoid(x) == 0.5 * (tanh(0.5*x) + 1): single EUP op per vreg.
        s = 0.5 * (jnp.tanh(0.5 * x) + 1.0)
        if needs_col_mask and k >= mask_from:
            valid = (lane + (col0 + k * 128)) < w_valid
            s = jnp.where(valid, s, 0.0)   # mask inputs, not products:
            t = jnp.where(valid, t, 0.0)   # garbage/NaN tail lanes cannot leak
        pt = pt + s * t
        pp = pp + s * s
        tt = tt + t * t

    acc_ref[:, 0:128] += pt
    acc_ref[:, 128:256] += pp
    acc_ref[:, 256:384] += tt


def dice_loss_v1(p, t, *, epsilon=EPSILON, per_image=True):
    """Pallas implementation of DiceLossV1.forward (per_image supported,
    ignore_empty=False)."""
    # TODO(synk): ignore_empty=True needs data-dependent row filtering on
    # sum(t) > 0 and an early-return 0.5; not implemented (module default False).
    N, C, H, W = p.shape
    R = N * C
    HW = H * W

    # Fold part of the pixel axis into the row axis (exact divisor => free
    # metadata reshape, no HBM traffic) so the sublane dim is fat and grid
    # axis 0 ("parallel") gets several tiles for the v7x megacore.
    fold = _choose_fold(R, HW)
    R_sub = R * fold
    W_sub = HW // fold

    p2 = p.reshape(R_sub, W_sub)
    t2 = t.reshape(R_sub, W_sub)

    p_item = jnp.dtype(p.dtype).itemsize
    t_item = jnp.dtype(t.dtype).itemsize
    packing = max(_sublane_packing(p.dtype), _sublane_packing(t.dtype))

    # Row tile: small enough that the three (tr,128) accumulators live in
    # vregs; split into >= 2 tiles when possible so both v7x cores get work.
    tr = min(_round_up(R_sub, packing), _ROW_TILE)
    n_row = _cdiv(R_sub, tr)
    if n_row == 1 and R_sub >= 2 * packing:
        tr = _round_up(_cdiv(R_sub, 2), packing)
        n_row = _cdiv(R_sub, tr)
    R_pad = n_row * tr          # only the tiny f32 output is padded, not inputs

    # Column tile: ~_BLOCK_TARGET_BYTES per input block, multiple of 128 lanes,
    # bounded unroll.  The ragged tail (W_sub % tc) is masked in-kernel.
    max_item = max(p_item, t_item)
    tc_bytes = max(128, (_BLOCK_TARGET_BYTES // (tr * max_item)) // 128 * 128)
    tc = min(_round_up(W_sub, 128), _MAX_LANE_CHUNKS * 128, tc_bytes)
    n_col = _cdiv(W_sub, tc)
    needs_col_mask = (W_sub % tc) != 0

    kernel = functools.partial(
        _dice_sums_kernel,
        tc=tc, n_col=n_col, w_valid=W_sub, needs_col_mask=needs_col_mask)

    # VMEM: 2 pipeline buffers per input + double-buffered fused accumulator.
    # Clamp to 48 MiB so the same settings fit v7x's 64 MiB/TC VMEM.
    vmem_needed = 2 * tr * tc * (p_item + t_item) + 2 * tr * 384 * 4 + (2 << 20)
    vmem_limit = int(min(max(vmem_needed, 24 << 20), 48 << 20))

    elems = R_sub * W_sub
    cost = pl.CostEstimate(
        flops=8 * elems,
        transcendentals=elems,
        bytes_accessed=elems * (p_item + t_item) + R_pad * 384 * 4,
    )

    acc = pl.pallas_call(
        kernel,
        out_shape=jax.ShapeDtypeStruct((R_pad, 3 * 128), jnp.float32),
        grid_spec=pltpu.PrefetchScalarGridSpec(
            num_scalar_prefetch=0,
            grid=(n_row, n_col),
            in_specs=[
                pl.BlockSpec((tr, tc), lambda i, j: (i, j)),
                pl.BlockSpec((tr, tc), lambda i, j: (i, j)),
            ],
            out_specs=pl.BlockSpec((tr, 3 * 128), lambda i, j: (i, 0)),
        ),
        compiler_params=pltpu.CompilerParams(
            dimension_semantics=("parallel", "arbitrary"),
            vmem_limit_bytes=vmem_limit,
        ),
        cost_estimate=cost,
    )(p2, t2)

    # Tiny JAX epilogue: drop overhang rows, undo the fold, 128->1 lane reduce.
    acc = acc[:R_sub]
    pt = acc[:, 0:128].reshape(R, fold * 128).sum(axis=-1)
    pp = acc[:, 128:256].reshape(R, fold * 128).sum(axis=-1)
    tt = acc[:, 256:384].reshape(R, fold * 128).sum(axis=-1)

    if per_image:
        loss = 1.0 - (2.0 * pt + epsilon) / (tt + pp + epsilon)
        return jnp.mean(loss)
    return 1.0 - (2.0 * jnp.sum(pt) + epsilon) / (jnp.sum(tt) + jnp.sum(pp) + epsilon)


def dice_loss_v1_ref(p, t, *, epsilon=EPSILON):
    """Pure-JAX reference mirroring the PyTorch forward (default flags)."""
    N, C, H, W = p.shape
    p = jax.nn.sigmoid(p.astype(jnp.float32)).reshape(N * C, -1)
    t = t.reshape(N * C, -1).astype(jnp.float32)
    num = 2.0 * jnp.sum(p * t, axis=-1) + epsilon
    den = jnp.sum(t * t, axis=-1) + jnp.sum(p * p, axis=-1) + epsilon
    return jnp.mean(1.0 - num / den)


if __name__ == "__main__":
    key = jax.random.PRNGKey(0)
    k1, k2, k3, k4 = jax.random.split(key, 4)

    # Primary case: lane-aligned spatial dims.
    N, C, H, W = 2, 4, 16, 16
    logits = jax.random.normal(k1, (N, C, H, W), dtype=jnp.float32)
    targets = (jax.random.uniform(k2, (N, C, H, W)) > 0.5).astype(jnp.float32)
    loss = jax.block_until_ready(dice_loss_v1(logits, targets))
    ref = dice_loss_v1_ref(logits, targets)
    assert jnp.allclose(loss, ref, rtol=1e-5, atol=1e-6), (loss, ref)

    # Ragged case: exercises the in-kernel tail-lane mask and row overhang.
    N2, C2, H2, W2 = 3, 3, 15, 15
    logits2 = jax.random.normal(k3, (N2, C2, H2, W2), dtype=jnp.float32)
    targets2 = (jax.random.uniform(k4, (N2, C2, H2, W2)) > 0.5).astype(jnp.float32)
    loss2 = jax.block_until_ready(dice_loss_v1(logits2, targets2))
    ref2 = dice_loss_v1_ref(logits2, targets2)
    assert jnp.allclose(loss2, ref2, rtol=1e-5, atol=1e-6), (loss2, ref2)

    print("KERNEL_OK")
</pallas_src>

<mosaic_0001>
module attributes {stable_mosaic.version = 11 : i64} {
  func.func @_dice_sums_kernel(%arg0: i32, %arg1: i32, %arg2: memref<8x256xf32, #tpu.memory_space<vmem>>, %arg3: memref<8x256xf32, #tpu.memory_space<vmem>>, %arg4: memref<8x384xf32, #tpu.memory_space<vmem>>) attributes {dimension_semantics = [#tpu.dimension_semantics<parallel>, #tpu.dimension_semantics<arbitrary>], iteration_bounds = array<i64: 1, 1>, scalar_prefetch = 0 : i64, scratch_operands = 0 : i64, tpu.core_type = #tpu.core_type<tc>, window_params = [{transform_indices = @transform_0, window_bounds = array<i64: 8, 256>}, {transform_indices = @transform_1, window_bounds = array<i64: 8, 256>}, {transform_indices = @transform_2, window_bounds = array<i64: 8, 384>}]} {
    %c0_i32 = arith.constant 0 : i32
    %0 = arith.cmpi eq, %arg1, %c0_i32 : i32
    %1 = arith.extui %0 : i1 to i32
    %c0_i32_0 = arith.constant 0 : i32
    %2 = arith.cmpi ne, %1, %c0_i32_0 : i32
    scf.if %2 {
      %cst_26 = arith.constant 0.000000e+00 : f32
      %45 = vector.broadcast %cst_26 : f32 to vector<8x384xf32>
      %c0_27 = arith.constant 0 : index
      %c0_28 = arith.constant 0 : index
      %46 = vector.load %arg4[%c0_27, %c0_28] : memref<8x384xf32, #tpu.memory_space<vmem>>, vector<8x384xf32>
      tpu.vector_store %arg4[%c0_27, %c0_28], %45 {strides = array<i32>} : memref<8x384xf32, #tpu.memory_space<vmem>>, vector<8x384xf32>,
    } else {
    }
    %cst = arith.constant 0.000000e+00 : f32
    %3 = vector.broadcast %cst : f32 to vector<8x128xf32>
    %cst_1 = arith.constant 0.000000e+00 : f32
    %4 = vector.broadcast %cst_1 : f32 to vector<8x128xf32>
    %cst_2 = arith.constant 0.000000e+00 : f32
    %5 = vector.broadcast %cst_2 : f32 to vector<8x128xf32>
    %c0 = arith.constant 0 : index
    %c0_3 = arith.constant 0 : index
    %6 = vector.load %arg2[%c0, %c0_3] : memref<8x256xf32, #tpu.memory_space<vmem>>, vector<8x128xf32>
    %c0_4 = arith.constant 0 : index
    %c0_5 = arith.constant 0 : index
    %7 = vector.load %arg3[%c0_4, %c0_5] : memref<8x256xf32, #tpu.memory_space<vmem>>, vector<8x128xf32>
    %cst_6 = arith.constant 5.000000e-01 : f32
    %8 = vector.broadcast %cst_6 : f32 to vector<8x128xf32>
    %9 = arith.mulf %8, %6 : vector<8x128xf32>
    %10 = math.tanh %9 : vector<8x128xf32>
    %cst_7 = arith.constant 1.000000e+00 : f32
    %11 = vector.broadcast %cst_7 : f32 to vector<8x128xf32>
    %12 = arith.addf %10, %11 : vector<8x128xf32>
    %cst_8 = arith.constant 5.000000e-01 : f32
    %13 = vector.broadcast %cst_8 : f32 to vector<8x128xf32>
    %14 = arith.mulf %13, %12 : vector<8x128xf32>
    %15 = arith.mulf %14, %7 : vector<8x128xf32>
    %16 = arith.addf %3, %15 : vector<8x128xf32>
    %17 = arith.mulf %14, %14 : vector<8x128xf32>
    %18 = arith.addf %4, %17 : vector<8x128xf32>
    %19 = arith.mulf %7, %7 : vector<8x128xf32>
    %20 = arith.addf %5, %19 : vector<8x128xf32>
    %c0_9 = arith.constant 0 : index
    %c128 = arith.constant 128 : index
    %21 = vector.load %arg2[%c0_9, %c128] : memref<8x256xf32, #tpu.memory_space<vmem>>, vector<8x128xf32>
    %c0_10 = arith.constant 0 : index
    %c128_11 = arith.constant 128 : index
    %22 = vector.load %arg3[%c0_10, %c128_11] : memref<8x256xf32, #tpu.memory_space<vmem>>, vector<8x128xf32>
    %cst_12 = arith.constant 5.000000e-01 : f32
    %23 = vector.broadcast %cst_12 : f32 to vector<8x128xf32>
    %24 = arith.mulf %23, %21 : vector<8x128xf32>
    %25 = math.tanh %24 : vector<8x128xf32>
    %cst_13 = arith.constant 1.000000e+00 : f32
    %26 = vector.broadcast %cst_13 : f32 to vector<8x128xf32>
    %27 = arith.addf %25, %26 : vector<8x128xf32>
    %cst_14 = arith.constant 5.000000e-01 : f32
    %28 = vector.broadcast %cst_14 : f32 to vector<8x128xf32>
    %29 = arith.mulf %28, %27 : vector<8x128xf32>
    %30 = arith.mulf %29, %22 : vector<8x128xf32>
    %31 = arith.addf %16, %30 : vector<8x128xf32>
    %32 = arith.mulf %29, %29 : vector<8x128xf32>
    %33 = arith.addf %18, %32 : vector<8x128xf32>
    %34 = arith.mulf %22, %22 : vector<8x128xf32>
    %35 = arith.addf %20, %34 : vector<8x128xf32>
    %c0_15 = arith.constant 0 : index
    %c0_16 = arith.constant 0 : index
    %36 = vector.load %arg4[%c0_15, %c0_16] : memref<8x384xf32, #tpu.memory_space<vmem>>, vector<8x128xf32>
    %37 = arith.addf %36, %31 : vector<8x128xf32>
    %c0_17 = arith.constant 0 : index
    %c0_18 = arith.constant 0 : index
    %38 = vector.load %arg4[%c0_17, %c0_18] : memref<8x384xf32, #tpu.memory_space<vmem>>, vector<8x128xf32>
    tpu.vector_store %arg4[%c0_17, %c0_18], %37 {strides = array<i32>} : memref<8x384xf32, #tpu.memory_space<vmem>>, vector<8x128xf32>,
    %c0_19 = arith.constant 0 : index
    %c128_20 = arith.constant 128 : index
    %39 = vector.load %arg4[%c0_19, %c128_20] : memref<8x384xf32, #tpu.memory_space<vmem>>, vector<8x128xf32>
    %40 = arith.addf %39, %33 : vector<8x128xf32>
    %c0_21 = arith.constant 0 : index
    %c128_22 = arith.constant 128 : index
    %41 = vector.load %arg4[%c0_21, %c128_22] : memref<8x384xf32, #tpu.memory_space<vmem>>, vector<8x128xf32>
    tpu.vector_store %arg4[%c0_21, %c128_22], %40 {strides = array<i32>} : memref<8x384xf32, #tpu.memory_space<vmem>>, vector<8x128xf32>,
    %c0_23 = arith.constant 0 : index
    %c256 = arith.constant 256 : index
    %42 = vector.load %arg4[%c0_23, %c256] : memref<8x384xf32, #tpu.memory_space<vmem>>, vector<8x128xf32>
    %43 = arith.addf %42, %35 : vector<8x128xf32>
    %c0_24 = arith.constant 0 : index
    %c256_25 = arith.constant 256 : index
    %44 = vector.load %arg4[%c0_24, %c256_25] : memref<8x384xf32, #tpu.memory_space<vmem>>, vector<8x128xf32>
    tpu.vector_store %arg4[%c0_24, %c256_25], %43 {strides = array<i32>} : memref<8x384xf32, #tpu.memory_space<vmem>>, vector<8x128xf32>,
    return
  }
  func.func @transform_0(%arg0: i32, %arg1: i32) -> (i32, i32) {
    %c0_i32 = arith.constant 0 : i32
    return %arg0, %arg1 : i32, i32
  }
  func.func @transform_1(%arg0: i32, %arg1: i32) -> (i32, i32) {
    %c0_i32 = arith.constant 0 : i32
    return %arg0, %arg1 : i32, i32
  }
  func.func @transform_2(%arg0: i32, %arg1: i32) -> (i32, i32) {
    %c0_i32 = arith.constant 0 : i32
    %c0_i32_0 = arith.constant 0 : i32
    return %arg0, %c0_i32 : i32, i32
  }
}

</mosaic_0001>

<bundles_post_ra>
// kernel: tpu_custom_call.1
= control target key start
LH: loop header
LB: loop body
LE: loop exit
PB: predicated region body
PF: predicated region fallthrough
CT: control target
= control target key end

     0   :  { %7 = vsyncpa [#allocation3], 0  ;;  %s226_s0 = inlined_call_operand.hbm [shape: f32[8,256], index: 0, kind: input, shape index: {}]   ;;  %s227_s1 = inlined_call_operand.hbm [shape: f32[8,256], index: 1, kind: input, shape index: {}]   ;;  %s228_s2 = inlined_call_operand.hbm [shape: f32[8,384], index: 2, kind: output, shape index: {}]  }
   0x1   :  { %8 = vsyncpa [#allocation6], 0 }
   0x2   :  { %9 = vsyncpa [#allocation4], 0  ;;  %s172_s9 = smov [#allocation2]   ;;  %s173_s11 = smov [#allocation5]  }
   0x3   :  { %s16_s10 = sshll.u32 %s172_s9, 4  ;;  %s26_s12 = sshll.u32 %s173_s11, 4  ;;  %s17_s10 = int_to_ptr.vmem [resolvable:$true] %s16_s10  ;;  %s27_s12 = int_to_ptr.vmem [resolvable:$true] %s26_s12 }
   0x4   :  { %s100_s15 = scalar_lea.hbm %s226_s0, 256 }
   0x5   :  { %p101_p0 = scmp.ne.s32.totalorder %s226_s0, %s100_s15  ;;  %p104_p1 = scmp.lt.u32.totalorder %s100_s15, %s226_s0 }
   0x7   :  { %p106_p2 = pnand %p104_p1, %p101_p0 }
   0x9   :  { %109 = shalt.err (!%p106_p2)
}
   0xa   :  { %s110_s20 = scalar_lea.vmem %s17_s10, 256  ;;  %p115_p4 = scmp.lt.s32.totalorder %s17_s10, %s17_s10 }
   0xb   :  { %p111_p3 = scmp.ne.s32.totalorder %s17_s10, %s110_s20  ;;  %p116_p5 = scmp.lt.s32.totalorder %s110_s20, %s110_s20 }
   0xd   :  { %p117_p6 = por %p116_p5, %p115_p4 }
   0xf   :  { %p118_p7 = pnand %p117_p6, %p111_p3 }
  0x11   :  { %121 = shalt.err (!%p118_p7)
}
  0x12   :  { %19 = dma.hbm_to_vmem [thread:$0]  %s226_s0, 256, %s17_s10, [#allocation3]  }
  0x13   :  { %s122_s25 = scalar_lea.hbm %s227_s1, 256 }
  0x14   :  { %p123_p8 = scmp.ne.s32.totalorder %s227_s1, %s122_s25  ;;  %p126_p9 = scmp.lt.u32.totalorder %s122_s25, %s227_s1 }
  0x16   :  { %p128_p10 = pnand %p126_p9, %p123_p8 }
  0x18   :  { %131 = shalt.err (!%p128_p10)
}
  0x19   :  { %s132_s30 = scalar_lea.vmem %s27_s12, 256  ;;  %p137_p12 = scmp.lt.s32.totalorder %s27_s12, %s27_s12 }
  0x1a   :  { %p133_p11 = scmp.ne.s32.totalorder %s27_s12, %s132_s30  ;;  %p138_p13 = scmp.lt.s32.totalorder %s132_s30, %s132_s30 }
  0x1c   :  { %p139_p0 = por %p138_p13, %p137_p12 }
  0x1e   :  { %p140_p1 = pnand %p139_p0, %p133_p11 }
  0x20   :  { %143 = shalt.err (!%p140_p1)
}
  0x21   :  { %29 = dma.hbm_to_vmem [thread:$0]  %s227_s1, 256, %s27_s12, [#allocation6]  }
  0x22   :  { %166 = dma.done.wait [#allocation3], 256  }
  0x23   :  { %167 = vsyncadd [#allocation3], 4294967040 }
  0x24   :  { %168 = dma.done.wait [#allocation6], 256  }
  0x25   :  { %169 = vsyncadd [#allocation6], 4294967040  ;;  %v43_v0 = vld [vmem:[#allocation2] sm:$0xff]  ;;  %v44_v1 = vld [vmem:[#allocation5] sm:$0xff]  ;;  %s174_s1 = smov [#allocation7]  }
  0x26   :  { %v55_v2 = vld [vmem:[#allocation2 + $0x8] sm:$0xff]  ;;  %v45_v3 = vmul.f32 0.5, %v43_v0  ;;  %v56_v4 = vld [vmem:[#allocation5 + $0x8] sm:$0xff]  ;;  %v53_v6 = vmul.f32 %v44_v1, %v44_v1  ;;  %s82_s4 = sshll.u32 %s174_s1, 4  ;;  %s83_s4 = int_to_ptr.vmem [resolvable:$true] %s82_s4 }
  0x27   :  { %v57_v5 = vmul.f32 0.5, %v55_v2  ;;  %v65_v7 = vmul.f32 %v56_v4, %v56_v4  ;;  %s144_s5 = scalar_lea.vmem %s83_s4, 384  ;;  %p149_p3 = scmp.lt.s32.totalorder %s83_s4, %s83_s4 }
  0x28   :  { %96 = vtanh.f32 %v45_v3  ;;  %p145_p2 = scmp.ne.s32.totalorder %s83_s4, %s144_s5  ;;  %p150_p4 = scmp.lt.s32.totalorder %s144_s5, %s144_s5 }
  0x29   :  { %98 = vtanh.f32 %v57_v5  ;;  %v66_v8 = vadd.f32 %v65_v7, %v53_v6 }
  0x2a   :  { %p151_p5 = por %p150_p4, %p149_p3 }
  0x2b   :  { %75 = vst [vmem:[#allocation7 + $0x10] sm:$0xff] %v66_v8 }
  0x2c   :  { %p152_p6 = pnand %p151_p5, %p145_p2 }
  0x32   :  { %v97_v9 = vpop.eup %96 }
  0x33   :  { %v99_v10 = vpop.eup %98  ;;  %v47_v11 = vadd.f32 1.0, %v97_v9 }
  0x34   :  { %v59_v12 = vadd.f32 1.0, %v99_v10 }
  0x35   :  { %v48_v13 = vmul.f32 0.5, %v47_v11 }
  0x36   :  { %v60_v14 = vmul.f32 0.5, %v59_v12 }
  0x37   :  { %v49_v15 = vmul.f32 %v48_v13, %v44_v1  ;;  %v51_v16 = vmul.f32 %v48_v13, %v48_v13 }
  0x38   :  { %v61_v17 = vmul.f32 %v60_v14, %v56_v4  ;;  %v63_v18 = vmul.f32 %v60_v14, %v60_v14 }
  0x3a   :  { %v62_v19 = vadd.f32 %v61_v17, %v49_v15  ;;  %v64_v20 = vadd.f32 %v63_v18, %v51_v16 }
  0x3c   :  { %69 = vst [vmem:[#allocation7] sm:$0xff] %v62_v19  ;;  %72 = vst [vmem:[#allocation7 + $0x8] sm:$0xff] %v64_v20 }
  0x3d   :  { %155 = shalt.err (!%p152_p6)
}
  0x3e   :  { %s156_s8 = scalar_lea.hbm %s228_s2, 384 }
  0x3f   :  { %p157_p7 = scmp.ne.s32.totalorder %s228_s2, %s156_s8  ;;  %p160_p8 = scmp.lt.u32.totalorder %s156_s8, %s228_s2 }
  0x41   :  { %p162_p9 = pnand %p160_p8, %p157_p7 }
  0x43   :  { %165 = shalt.err (!%p162_p9)
}
  0x44   :  { %85 = dma.vmem_to_hbm [thread:$0]  %s83_s4, 384, %s228_s2, [#allocation4]  }
  0x45   :  { %170 = dma.done.wait [#allocation4], 384  }
  0x46   :  { %171 = vsyncadd [#allocation4], 4294966912 }
  0x47   :  { %89 = vsyncpa [#allocation3], 1 }
  0x48   :  { %90 = vsyncpa [#allocation6], 1 }
  0x49   :  { %91 = vsyncpa [#allocation4], 1 }

</bundles_post_ra>
